<compile_context>
chip_gen: v7x
topology: tpu7x:2x2x1
jax: 0.10.0
libtpu: 0.0.40
codegen_flags: <defaults>
</compile_context>

<pallas_src>
import math

import jax
import jax.numpy as jnp
import numpy as np
from jax import lax
from jax.experimental import pallas as pl
from jax.experimental.pallas import tpu as pltpu


def _round_up(a, b):
    return ((a + b - 1) // b) * b


# ----------------------------- Pallas kernel ------------------------------ #
def point_embed_kernel(x_ref, a_ref, phase_ref, mask_ref, w_ref, o_ref):
    # x_ref:     (TN, data_dim)  tile of flattened points
    # a_ref:     (data_dim, K)   augmented projection [basis|basis|I|0]
    # phase_ref: (1, K)          sin phase (+pi/2 on cos lanes, 1.0 bias lane)
    # mask_ref:  (1, K)          1.0 on trig lanes, 0.0 on passthrough lanes
    # w_ref:     (K, dim)        stacked MLP weight [w_sin; w_cos; w_x; bias]
    # o_ref:     (TN, dim)       output tile
    x = x_ref[...]
    a = a_ref[...]
    data_dim = x.shape[1]

    # K = data_dim (=3) contraction as unrolled VPU broadcast FMAs; the phase
    # row seeds the accumulator (cos lanes get +pi/2, bias lane gets 1.0).
    proj = phase_ref[...] + x[:, 0:1] * a[0:1, :]          # (TN, K)
    for d in range(1, data_dim):
        proj = proj + x[:, d:d + 1] * a[d:d + 1, :]

    # sin only (cos via phase); passthrough lanes (raw x, bias) gated by the
    # precomputed mask row with an arithmetic blend — no iota, no select.
    feat = proj + mask_ref[...] * (jnp.sin(proj) - proj)   # (TN, K)

    # Single MXU matmul per row tile. DEFAULT precision = one bf16 operand
    # pass with f32 accumulation (matches XLA's natural einsum lowering).
    out = jnp.dot(feat, w_ref[...],
                  preferred_element_type=jnp.float32,
                  precision=lax.Precision.DEFAULT)
    o_ref[...] = out.astype(o_ref.dtype)


# -------------------- One-time parameter preparation ----------------------- #
def prepare_point_embed_params(basis, weight, bias):
    """Hoisted per-model prep. basis: (data_dim, E/2); weight: (dim, E+data_dim)
    in torch layout (out, in); bias: (dim,). Returns (A, phase, mask, W)."""
    data_dim, half_e = basis.shape
    E = 2 * half_e
    dim, in_feats = weight.shape
    assert in_feats == E + data_dim
    K = E + data_dim + 1

    # Augmented projection matrix: [basis | basis | I_dd | 0]
    a = jnp.zeros((data_dim, K), dtype=jnp.float32)
    a = a.at[:, :half_e].set(basis)
    a = a.at[:, half_e:E].set(basis)
    a = a.at[:, E:E + data_dim].set(jnp.eye(data_dim, dtype=jnp.float32))

    # Phase row: +pi/2 on cos lanes (cos z == sin(z + pi/2)), 1.0 on bias lane.
    phase = jnp.zeros((1, K), dtype=jnp.float32)
    phase = phase.at[0, half_e:E].set(jnp.pi / 2)
    phase = phase.at[0, E + data_dim].set(1.0)

    # Sin mask: 1 on trig lanes, 0 on passthrough (raw x, bias) lanes.
    mask = jnp.zeros((1, K), dtype=jnp.float32)
    mask = mask.at[0, :E].set(1.0)

    # Stacked weight (K, dim): rows for [sin | cos | x | bias-lane].
    w = jnp.concatenate([weight.T, bias.reshape(1, dim)], axis=0)
    return a, phase, mask, w


# ------------------------------- Wrapper ----------------------------------- #
def point_embed_forward(x, a, phase, mask, w, *, tile_n=4096):
    """x: (B, N, data_dim). (a, phase, mask, w) from prepare_point_embed_params.
    Returns (B, N, dim)."""
    B, N, data_dim = x.shape
    K, dim = w.shape
    M = B * N
    x_flat = x.reshape(M, data_dim)

    # Row-tile selection:
    #   * multiple of 8 sublanes,
    #   * >= 2 near-equal grid steps (even count) so the "parallel" axis keeps
    #     both v7x TensorCores busy with balanced work,
    #   * large default (4096) so the ~0.35 us per-grid-step overhead amortizes.
    if M <= 8:
        tile_n = 8
    else:
        num_tiles = max(2, pl.cdiv(M, tile_n))
        num_tiles += num_tiles % 2                       # even → balanced split
        tile_n = _round_up(pl.cdiv(M, num_tiles), 8)
    grid = (pl.cdiv(M, tile_n),)

    # Double-buffered VMEM estimate: x block is lane-padded to 128 in VMEM.
    est_vmem = 2 * tile_n * 4 * (128 + dim) + 4 * K * (dim + 8)
    vmem_limit = None
    if est_vmem > (12 << 20):
        # Raise the scoped limit (16 MiB default on v5e) if a big tile needs it.
        vmem_limit = min(int(est_vmem * 1.25) + (4 << 20), 56 << 20)

    out_flat = pl.pallas_call(
        point_embed_kernel,
        out_shape=jax.ShapeDtypeStruct((M, dim), x.dtype),
        grid=grid,
        in_specs=[
            pl.BlockSpec((tile_n, data_dim), lambda i: (i, 0)),
            pl.BlockSpec((data_dim, K), lambda i: (0, 0)),
            pl.BlockSpec((1, K), lambda i: (0, 0)),
            pl.BlockSpec((1, K), lambda i: (0, 0)),
            pl.BlockSpec((K, dim), lambda i: (0, 0)),
        ],
        out_specs=pl.BlockSpec((tile_n, dim), lambda i: (i, 0)),
        compiler_params=pltpu.CompilerParams(
            dimension_semantics=("parallel",),
            vmem_limit_bytes=vmem_limit),
    )(x_flat, a, phase, mask, w)

    return out_flat.reshape(B, N, dim)


# -------------------------- Parameter construction ------------------------- #
def make_params(data_dim=3, hidden_dim=48, dim=128, seed=0):
    cos_sin_data_dim = 2 * data_dim
    # NOTE: matches the PyTorch spec literally (ceil applied to an already
    # floored integer division).
    embedding_dim = math.ceil(hidden_dim // cos_sin_data_dim) * cos_sin_data_dim

    n_freq = embedding_dim // cos_sin_data_dim
    e = (2.0 ** np.arange(n_freq)).astype(np.float32) * np.pi
    basis = np.zeros((data_dim, data_dim * n_freq), dtype=np.float32)
    for i in range(data_dim):
        basis[i, n_freq * i:n_freq * (i + 1)] = e
    basis = jnp.asarray(basis)

    in_feats = embedding_dim + data_dim
    key = jax.random.PRNGKey(seed)
    kw, kb = jax.random.split(key)
    bound = 1.0 / math.sqrt(in_feats)  # mimic torch nn.Linear default init
    weight = jax.random.uniform(kw, (dim, in_feats), jnp.float32, -bound, bound)
    bias = jax.random.uniform(kb, (dim,), jnp.float32, -bound, bound)
    return basis, weight, bias, embedding_dim


# ------------------------------ Reference ---------------------------------- #
def point_embed_reference(x, basis, weight, bias):
    proj = jnp.einsum('bnd,de->bne', x, basis)
    emb = jnp.concatenate([jnp.sin(proj), jnp.cos(proj), x], axis=2)
    return jnp.einsum('bni,oi->bno', emb, weight) + bias


if __name__ == "__main__":
    data_dim, hidden_dim, dim = 3, 48, 128
    B, N = 2, 16

    basis, weight, bias, embedding_dim = make_params(data_dim, hidden_dim, dim)
    a, phase, mask, w = prepare_point_embed_params(basis, weight, bias)

    key = jax.random.PRNGKey(0)
    x = jax.random.normal(key, (B, N, data_dim), dtype=jnp.float32)

    out = point_embed_forward(x, a, phase, mask, w)
    out = jax.block_until_ready(out)

    ref = point_embed_reference(x, basis, weight, bias)
    assert out.shape == (B, N, dim)
    # Tolerance reflects single-pass bf16 MXU operands (DEFAULT precision, the
    # same as XLA's natural einsum lowering) incl. the bias-lane bf16 rounding.
    np.testing.assert_allclose(np.asarray(out), np.asarray(ref),
                               rtol=5e-3, atol=5e-3)
    print("KERNEL_OK")
</pallas_src>

<mosaic_0001>
module attributes {stable_mosaic.version = 11 : i64} {
  func.func @point_embed_kernel(%arg0: i32, %arg1: memref<16x3xf32, #tpu.memory_space<vmem>>, %arg2: memref<3x52xf32, #tpu.memory_space<vmem>>, %arg3: memref<1x52xf32, #tpu.memory_space<vmem>>, %arg4: memref<1x52xf32, #tpu.memory_space<vmem>>, %arg5: memref<52x128xf32, #tpu.memory_space<vmem>>, %arg6: memref<16x128xf32, #tpu.memory_space<vmem>>) attributes {dimension_semantics = [#tpu.dimension_semantics<parallel>], iteration_bounds = array<i64: 2>, scalar_prefetch = 0 : i64, scratch_operands = 0 : i64, tpu.core_type = #tpu.core_type<tc>, window_params = [{transform_indices = @transform_0, window_bounds = array<i64: 16, 3>}, {pipeline_mode = #tpu.pipeline_mode<synchronous>, transform_indices = @transform_1, window_bounds = array<i64: 3, 52>}, {pipeline_mode = #tpu.pipeline_mode<synchronous>, transform_indices = @transform_2, window_bounds = array<i64: 1, 52>}, {pipeline_mode = #tpu.pipeline_mode<synchronous>, transform_indices = @transform_3, window_bounds = array<i64: 1, 52>}, {pipeline_mode = #tpu.pipeline_mode<synchronous>, transform_indices = @transform_4, window_bounds = array<i64: 52, 128>}, {transform_indices = @transform_5, window_bounds = array<i64: 16, 128>}]} {
    %c0 = arith.constant 0 : index
    %c0_0 = arith.constant 0 : index
    %0 = vector.load %arg1[%c0, %c0_0] : memref<16x3xf32, #tpu.memory_space<vmem>>, vector<16x3xf32>
    %c0_1 = arith.constant 0 : index
    %c0_2 = arith.constant 0 : index
    %1 = vector.load %arg2[%c0_1, %c0_2] : memref<3x52xf32, #tpu.memory_space<vmem>>, vector<3x52xf32>
    %c0_3 = arith.constant 0 : index
    %c0_4 = arith.constant 0 : index
    %2 = vector.load %arg3[%c0_3, %c0_4] : memref<1x52xf32, #tpu.memory_space<vmem>>, vector<1x52xf32>
    %3 = vector.extract_strided_slice %0 {offsets = [0, 0], sizes = [16, 1], strides = [1, 1]} : vector<16x3xf32> to vector<16x1xf32>
    %4 = vector.extract_strided_slice %1 {offsets = [0, 0], sizes = [1, 52], strides = [1, 1]} : vector<3x52xf32> to vector<1x52xf32>
    %5 = vector.broadcast %3 : vector<16x1xf32> to vector<16x52xf32>
    %6 = vector.broadcast %4 : vector<1x52xf32> to vector<16x52xf32>
    %7 = arith.mulf %5, %6 : vector<16x52xf32>
    %8 = vector.broadcast %2 : vector<1x52xf32> to vector<16x52xf32>
    %9 = arith.addf %8, %7 : vector<16x52xf32>
    %10 = vector.extract_strided_slice %0 {offsets = [0, 1], sizes = [16, 1], strides = [1, 1]} : vector<16x3xf32> to vector<16x1xf32>
    %11 = vector.extract_strided_slice %1 {offsets = [1, 0], sizes = [1, 52], strides = [1, 1]} : vector<3x52xf32> to vector<1x52xf32>
    %12 = vector.broadcast %10 : vector<16x1xf32> to vector<16x52xf32>
    %13 = vector.broadcast %11 : vector<1x52xf32> to vector<16x52xf32>
    %14 = arith.mulf %12, %13 : vector<16x52xf32>
    %15 = arith.addf %9, %14 : vector<16x52xf32>
    %16 = vector.extract_strided_slice %0 {offsets = [0, 2], sizes = [16, 1], strides = [1, 1]} : vector<16x3xf32> to vector<16x1xf32>
    %17 = vector.extract_strided_slice %1 {offsets = [2, 0], sizes = [1, 52], strides = [1, 1]} : vector<3x52xf32> to vector<1x52xf32>
    %18 = vector.broadcast %16 : vector<16x1xf32> to vector<16x52xf32>
    %19 = vector.broadcast %17 : vector<1x52xf32> to vector<16x52xf32>
    %20 = arith.mulf %18, %19 : vector<16x52xf32>
    %21 = arith.addf %15, %20 : vector<16x52xf32>
    %c0_5 = arith.constant 0 : index
    %c0_6 = arith.constant 0 : index
    %22 = vector.load %arg4[%c0_5, %c0_6] : memref<1x52xf32, #tpu.memory_space<vmem>>, vector<1x52xf32>
    %23 = math.sin %21 : vector<16x52xf32>
    %24 = arith.subf %23, %21 : vector<16x52xf32>
    %25 = vector.broadcast %22 : vector<1x52xf32> to vector<16x52xf32>
    %26 = arith.mulf %25, %24 : vector<16x52xf32>
    %27 = arith.addf %21, %26 : vector<16x52xf32>
    %c0_7 = arith.constant 0 : index
    %c0_8 = arith.constant 0 : index
    %28 = vector.load %arg5[%c0_7, %c0_8] : memref<52x128xf32, #tpu.memory_space<vmem>>, vector<52x128xf32>
    %cst = arith.constant dense<0.000000e+00> : vector<16x128xf32>
    %29 = tpu.matmul %27, %28, %cst {dimension_numbers = #tpu.dot_dimension_numbers<[1], [0], [0], [1], [0, 0, 1, 1], [], []>} : vector<16x52xf32>, vector<52x128xf32>, vector<16x128xf32> -> vector<16x128xf32>
    %c0_9 = arith.constant 0 : index
    %c0_10 = arith.constant 0 : index
    %30 = vector.load %arg6[%c0_9, %c0_10] : memref<16x128xf32, #tpu.memory_space<vmem>>, vector<16x128xf32>
    tpu.vector_store %arg6[%c0_9, %c0_10], %29 {strides = array<i32>} : memref<16x128xf32, #tpu.memory_space<vmem>>, vector<16x128xf32>,
    return
  }
  func.func @transform_0(%arg0: i32) -> (i32, i32) {
    %c0_i32 = arith.constant 0 : i32
    %c0_i32_0 = arith.constant 0 : i32
    return %arg0, %c0_i32 : i32, i32
  }
  func.func @transform_1(%arg0: i32) -> (i32, i32) {
    %c0_i32 = arith.constant 0 : i32
    %c0_i32_0 = arith.constant 0 : i32
    %c0_i32_1 = arith.constant 0 : i32
    return %c0_i32, %c0_i32_0 : i32, i32
  }
  func.func @transform_2(%arg0: i32) -> (i32, i32) {
    %c0_i32 = arith.constant 0 : i32
    %c0_i32_0 = arith.constant 0 : i32
    %c0_i32_1 = arith.constant 0 : i32
    return %c0_i32, %c0_i32_0 : i32, i32
  }
  func.func @transform_3(%arg0: i32) -> (i32, i32) {
    %c0_i32 = arith.constant 0 : i32
    %c0_i32_0 = arith.constant 0 : i32
    %c0_i32_1 = arith.constant 0 : i32
    return %c0_i32, %c0_i32_0 : i32, i32
  }
  func.func @transform_4(%arg0: i32) -> (i32, i32) {
    %c0_i32 = arith.constant 0 : i32
    %c0_i32_0 = arith.constant 0 : i32
    %c0_i32_1 = arith.constant 0 : i32
    return %c0_i32, %c0_i32_0 : i32, i32
  }
  func.func @transform_5(%arg0: i32) -> (i32, i32) {
    %c0_i32 = arith.constant 0 : i32
    %c0_i32_0 = arith.constant 0 : i32
    return %arg0, %c0_i32 : i32, i32
  }
}

</mosaic_0001>

<bundles_post_ra>
// kernel: tpu_custom_call.1
= control target key start
LH: loop header
LB: loop body
LE: loop exit
PB: predicated region body
PF: predicated region fallthrough
CT: control target
= control target key end

     0   :  { %10 = vsyncpa [#allocation3], 0  ;;  %s1211_s0 = inlined_call_operand.vmem [shape: f32[32,3], index: 0, kind: input, shape index: {}]   ;;  %s1212_s1 = inlined_call_operand.vmem [shape: f32[3,52], index: 1, kind: input, shape index: {}]   ;;  %s1213_s2 = inlined_call_operand.vmem [shape: f32[1,52], index: 2, kind: input, shape index: {}]   ;;  %s1214_s3 = inlined_call_operand.vmem [shape: f32[1,52], index: 3, kind: input, shape index: {}]   ;;  %s1215_s4 = inlined_call_operand.hbm [shape: f32[52,128], index: 4, kind: input, shape index: {}]   ;;  %s1216_s5 = inlined_call_operand.hbm [shape: f32[32,128], index: 5, kind: output, shape index: {}]  }
   0x1   :  { %11 = vsyncpa [#allocation4], 0 }
   0x2   :  { %13 = vsyncpa [#allocation4 + $0x1], 0  ;;  %s995_s18 = smov 0   ;;  %s997_s19 = smov 0  }
   0x3   :  { %s999_s20 = smov 0   ;;  %s1001_s21 = smov 0  }
   0x4 LB: > { %s1016_s22 = sadd.s32 4294967295, %s948_s21   ;;  %s705_s23 = sadd.s32 4294967294, %s948_s21   ;;  %s948_s21 = sphi %s1001_s21, %s1232_s21   ;;  %s944_s20 = sphi %s999_s20, %s1231_s20   ;;  %s940_s19 = sphi %s997_s19, %s1230_s19   ;;  %s936_s18 = sphi %s995_s18, %s1229_s18  }
   0x5   : > { %s1020_s24 = sadd.s32 1, %s948_s21   ;;  %s136_s25 = sadd.s32 1, %s944_s20 }
   0x6   : > { %s133_s26 = ssub.s32 %s948_s21, %s1020_s24  ;;  %p146_p0 = scmp.ne.s32.totalorder %s944_s20, %s940_s19 }
   0x7   : > { %p134_p1 = scmp.eq.s32.totalorder %s133_s26, 0  ;;  %p147_p2 = scmp.eq.s32.totalorder %s1016_s22, 1 }
   0x8   : > { %p152_p3 = scmp.ne.s32.totalorder %s940_s19, %s936_s18  ;;  %p153_p4 = scmp.eq.s32.totalorder %s705_s23, 1 }
   0x9   : > { %s1031_s27 = scalar_select %p134_p1, %s944_s20, %s136_s25  }
   0xa   : > { %p1033_p5 = por %p147_p2, %p146_p0  ;;  %p1037_p6 = por %p153_p4, %p152_p3 }
   0xb   : > { %p706_p7 = scmp.ge.s32.totalorder %s948_s21, 1  ;;  %p160_p8 = scmp.lt.s32.totalorder %s948_s21, 3 }
   0xc   : > { %s1220_s28 = scalar_select %p1033_p5, 1, 0 }
   0xd   : > { %s1221_s29 = scalar_select %p1037_p6, 1, 0 }
   0xe   : > { %p1217_p9 = scmp.eq.s32.totalorder %s1016_s22, 0  ;;  %p1044_p10 = pnand %p706_p7, %p160_p8 }
   0xf   : > { %s950_s6 = smov [#allocation2]   ;;  %s854_s11 = scalar_lea.hbm %s1215_s4, 896 }
  0x10   : > { %s1222_s30 = scalar_select %p1044_p10, 1, 0 }
  0x11   : > { %s181_s7 = sshll.u32 %s950_s6, 4  ;;  %p785_p11 = pneg %p1044_p10  ;;  %s182_s7 = int_to_ptr.vmem [resolvable:$true] %s181_s7 }
  0x12   : > { %p855_p13 = scmp.ne.s32.totalorder %s1215_s4, %s854_s11  ;;  %p861_p3 = scmp.lt.u32.totalorder %s854_s11, %s1215_s4 }
  0x13   : > { %p1052_p12 = pnand %p1217_p9, %p785_p11 }
  0x15   : > { %p856_p0 = pneg %p1052_p12 }
  0x17   : > { %p857_p1 = pnand %p856_p0, %p855_p13 }
  0x19   : > { %p858_p2 = pneg %p857_p1 }
  0x1b   : > { %p863_p4 = pnand %p861_p3, %p858_p2 }
  0x1d   : > { %866 = shalt.err (!%p863_p4)
}
  0x1e   : > { %s867_s16 = scalar_lea.vmem %s182_s7, 896  ;;  %p875_p9 = scmp.lt.s32.totalorder %s182_s7, %s182_s7 }
  0x1f   : > { %p868_p7 = scmp.ne.s32.totalorder %s182_s7, %s867_s16  ;;  %p876_p6 = scmp.lt.s32.totalorder %s867_s16, %s867_s16 }
  0x21   : > { %p870_p8 = pnand %p868_p7, %p856_p0  ;;  %p877_p5 = por %p876_p6, %p875_p9 }
  0x23   : > { %p871_p11 = pneg %p870_p8 }
  0x25   : > { %p878_p10 = pnand %p877_p5, %p871_p11 }
  0x27   : > { %881 = shalt.err (!%p878_p10)
}
  0x28   : > { %s951_s17 = smov 128   ;;  %s952_s23 = smov 8  }
  0x29   : > { %788 = dma.hbm_to_vmem [thread:$0]  (!%p1052_p12), %s1215_s4, 896, %s182_s7, [#allocation3], %s951_s17, %s951_s17, %s952_s23  }
  0x2a   : > { %p1224_p13 = scmp.ne.s32.totalorder %s1222_s30, 0 }
  0x2b   : > { %p1225_p1 = scmp.eq.s32.totalorder (!%p1224_p13), %s1016_s22, 0 }
  0x2c   : > { %206 = sbr.rel (%p1224_p13) target bundleno = 523 (0x20b), region = 40 }
  0x33   : > { %927 = dma.done.wait (%p1225_p1), [#allocation3], 896   ;;  %p1226_p0 = pmov %p1225_p1 }
  0x34   : > { %s712_s6 = sshll.u32 %s1016_s22, 1  ;;  %v953_v0 = vmov 1   ;;  %v954_v1 = vmov 0   ;;  %v955_v4 = vmov 2   ;;  %v522_v5 = vld [vmem:[#allocation2] sm:$0xff]  ;;  %v523_v6 = vld [vmem:[#allocation2 + $0x8] sm:$0xff]  ;;  %v255_v15 = vlaneseq }
  0x35   : > { %929 = vsyncadd (%p1226_p0), [#allocation3], 4294966400  ;;  %843 = vset.pattern.permute.xlu1 %v953_v0  ;;  %842 = vset.pattern.permute.xlu0 %v954_v1  ;;  %p235_p5 = scmp.lt.s32.totalorder %s712_s6, 3  ;;  %v524_v7 = vld [vmem:[#allocation2 + $0x10] sm:$0xff]  ;;  %v759_v8 = vpack.c.bf16 %v523_v6, %v522_v5  ;;  %v525_v9 = vld [vmem:[#allocation2 + $0x18] sm:$0xff]  ;;  %vm536_vm0 = vcmask 1043456  }
  0x36   : > { %v763_v10 = vpack.c.bf16 %v525_v9, %v524_v7  ;;  %v526_v11 = vld [vmem:[#allocation2 + $0x20] sm:$0xff]  ;;  %v527_v12 = vld [vmem:[#allocation2 + $0x28] sm:$0xff]  ;;  %v528_v14 = vld [vmem:[#allocation2 + $0x30] sm:$0xf]  ;;  %v256_v16 = vshrl.u32 %v255_v15, 7  ;;  %s231_s16 = sand.u32 1, %s940_s19  }
  0x37   : > { %s1234_s6 = smov (!%p235_p5, %s712_s6), 3  ;;  %760 = vmatprep.subr.bf16.mxu0 %v759_v8  ;;  %v767_v13 = vpack.c.bf16 %v527_v12, %v526_v11  ;;  %v243_v18 = vld [vmem:[%s1212_s1] sm:$0x7]  ;;  %v957_v5 = vmov 2475754826   ;;  %s711_s17 = sshll.u32 %s231_s16, 4 }
  0x38   : > { %s713_s8 = sshll.u32 %s1234_s6, 3  ;;  %762 = vmatpush3.bf16.msra.mxu0 %v759_v8  ;;  %v257_v17 = vsub.s32 0, %v256_v16  ;;  %v279_v19 = vsub.s32 1, %v256_v16  ;;  %v295_v25 = vsub.s32 2, %v256_v16  ;;  %v714_v26 = vld [vmem:[%s1213_s2] ss:$0 sm:$0xff] }
  0x39   : > { %s238_s30 = scalar_lea.vmem %s1211_s0, %s713_s8  ;;  %764 = vmatprep.subr.bf16.mxu0 %v763_v10  ;;  %v958_v7 = vmov 2131351028   ;;  %v959_v11 = vmov 2102212464   ;;  %s233_s23 = scalar_lea.vmem [#allocation5], %s711_s17 }
  0x3a   : > { %v241_v2 = vld [vmem:[%s238_s30] sm:$0xff]  ;;  %v242_v3 = vld [vmem:[%s238_s30 + $0x8] sm:$0xff]  ;;  %v258_v20 = vrot.slane %v243_v18, %v257_v17  ;;  %v280_v23 = vrot.slane %v243_v18, %v279_v19  ;;  %v296_v32 = vrot.slane %v243_v18, %v295_v25  ;;  %v961_v17 = vmov 1326507024   ;;  %s631_s25 = sshll.u32 %s233_s23, 4  ;;  %s732_s26 = sshll.u32 %s1016_s22, 8  ;;  %s1163_s25 = int_to_ptr.vmem [resolvable:$true] %s631_s25 }
  0x3b   : > { %270 = vperm.xlu1 %843, %v241_v2   ;;  %247 = vperm.xlu0 %842, %v241_v2   ;;  %s1168_s9 = scalar_lea.hbm %s1216_s5, %s732_s26  ;;  %s1170_s7 = scalar_lea.sflag [#allocation4], %s231_s16 }
  0x3c   : > { %766 = vmatpush3.bf16.msra.mxu0 %v763_v10  ;;  %s882_s30 = scalar_lea.vmem %s1163_s25, 256  ;;  %p1227_p9 = scmp.ne.s32.totalorder %s1220_s28, 0 }
  0x3d   : > { %768 = vmatprep.subr.bf16.mxu0 %v767_v13  ;;  %p883_p6 = scmp.ne.s32.totalorder %s1163_s25, %s882_s30  ;;  %s962_s22 = smov [#allocation5]  }
  0x3e   : > { %s886_s10 = sshll.u32 %s962_s22, 4  ;;  %s887_s10 = int_to_ptr.vmem [resolvable:$false] %s886_s10 }
  0x3f   : > { %274 = vperm.xlu1 %843, %v242_v3   ;;  %252 = vperm.xlu0 %842, %v242_v3   ;;  %p884_p10 = pnand %p883_p6, %p1227_p9  ;;  %s888_s11 = scalar_lea.vmem %s887_s10, 512 }
  0x40   : > { %770 = vmatpush3.bf16.msra.mxu0 %v767_v13  ;;  %p889_p2 = scmp.lt.s32.totalorder %s1163_s25, %s887_s10  ;;  %p890_p3 = scmp.lt.s32.totalorder %s888_s11, %s882_s30 }
  0x41   : > { %754 = vmatprep.subr.msk.mxu0 %vm536_vm0, %v528_v14  ;;  %p885_p12 = pneg %p884_p10 }
  0x42   : > { %p891_p4 = por %p890_p3, %p889_p2 }
  0x43   : > { %845 = vset.pattern.permute.xlu1 %v955_v4  ;;  %844 = vset.pattern.permute.xlu0 %v955_v4 }
  0x44   : > { %290 = vperm.xlu1 %845, %v242_v3   ;;  %286 = vperm.xlu0 %844, %v241_v2   ;;  %v956_v3 = vmov 683565275   ;;  %p892_p7 = pnand %p891_p4, %p885_p12 }
  0x45   : > { %755 = vmatpush3.msk.msra.mxu0 %vm536_vm0, %v528_v14  ;;  %v960_v14 = vmov 920167782  }
  0xba   : > { %v271_v21 = vpop.permute.xlu1 %270  ;;  %v248_v22 = vpop.permute.xlu0 %247 }
  0xbb   : > { %v259_v24 = vmul.f32 %v258_v20, %v248_v22  ;;  %v281_v30 = vmul.f32 %v280_v23, %v271_v21 }
  0xbd   : > { %v267_v31 = vadd.f32 %v714_v26, %v259_v24 }
  0xbe   : > { %v275_v27 = vpop.permute.xlu1 %274  ;;  %v253_v28 = vpop.permute.xlu0 %252 }
  0xbf   : > { %v260_v29 = vmul.f32 %v258_v20, %v253_v28  ;;  %v282_v33 = vmul.f32 %v280_v23, %v275_v27  ;;  %v283_v39 = vadd.f32 %v281_v30, %v267_v31 }
  0xc1   : > { %v268_v34 = vadd.f32 %v714_v26, %v260_v29 }
  0xc3   : > { %v291_v35 = vpop.permute.xlu1 %290  ;;  %v284_v36 = vadd.f32 %v282_v33, %v268_v34  ;;  %v287_v37 = vpop.permute.xlu0 %286 }
  0xc4   : > { %v298_v38 = vmul.f32 %v296_v32, %v291_v35  ;;  %v297_v40 = vmul.f32 %v296_v32, %v287_v37 }
  0xc6   : > { %v1088_v41 = vadd.f32 %v298_v38, %v284_v36  ;;  %v1090_v42 = vadd.f32 %v297_v40, %v283_v39 }
  0xc8   : > { %v409_v43 = vand.u32 2139095040, %v1088_v41  ;;  %v305_v44 = vand.u32 2139095040, %v1090_v42  ;;  %v302_v45 = vand.u32 2147483647, %v1090_v42  ;;  %v406_v46 = vand.u32 2147483647, %v1088_v41 }
  0xc9   : > { %vm304_vm15 = vcmp.lt.s32.totalorder %v1090_v42, 0 }
  0xca   : > { %v410_v47 = vshrl.u32 %v409_v43, 23  ;;  %v306_v48 = vshrl.u32 %v305_v44, 23  ;;  %v309_v51 = vand.u32 8388607, %v302_v45  ;;  %v413_v52 = vand.u32 8388607, %v406_v46 }
  0xcb   : > { %vm303_vm0 = vcmp.le.f32.partialorder %v302_v45, 0.7853982 }
  0xcc   : > { %v719_v49 = vadd.s32 4294967169, %v410_v47  ;;  %v715_v50 = vadd.s32 4294967169, %v306_v48  ;;  %v310_v55 = vor.u32 8388608, %v309_v51  ;;  %v414_v56 = vor.u32 8388608, %v413_v52 }
  0xce   : > { %v416_v53 = vadd.s32 1, %v719_v49  ;;  %v312_v54 = vadd.s32 1, %v715_v50  ;;  %v1104_v0 = vshll.u32 %v310_v55, 8  ;;  %v1106_v1 = vshll.u32 %v414_v56, 8 }
  0xd0   : > { %vm417_vm1 = vcmp.gt.s32.totalorder %v416_v53, 0  ;;  %vm313_vm2 = vcmp.gt.s32.totalorder %v312_v54, 0 }
  0xd1   : > { %v418_v57 = vsel %vm417_vm1, %v416_v53, 0  ;;  %v314_v58 = vsel %vm313_vm2, %v312_v54, 0  ;;  %vm408_vm1 = vcmp.lt.s32.totalorder %v1088_v41, 0  ;;  %vm407_vm2 = vcmp.le.f32.partialorder %v406_v46, 0.7853982 }
  0xd2   : > { %v1100_v59 = vand.u32 31, %v418_v57  ;;  %v316_v60 = vand.u32 31, %v314_v58  ;;  %v315_v61 = vshrl.u32 %v314_v58, 5  ;;  %v1102_v62 = vshrl.u32 %v418_v57, 5 }
  0xd4   : > { %v317_v63 = vsub.s32 32, %v316_v60  ;;  %v421_v2 = vsub.s32 32, %v1100_v59  ;;  %v319_v4 = vshll.u32 %v956_v3, %v316_v60  ;;  %v322_v6 = vshll.u32 %v957_v5, %v316_v60 }
  0xd5   : > { %v325_v8 = vshll.u32 %v958_v7, %v316_v60  ;;  %v328_v13 = vshll.u32 %v959_v11, %v316_v60  ;;  %v331_v16 = vshll.u32 %v960_v14, %v316_v60  ;;  %vm334_vm3 = vcmp.lt.s32.totalorder %v315_v61, 1 }
  0xd6   : > { %v320_v9 = vshrl.u32 %v957_v5, %v317_v63  ;;  %v323_v10 = vshrl.u32 %v958_v7, %v317_v63  ;;  %v326_v12 = vshrl.u32 %v959_v11, %v317_v63  ;;  %v329_v15 = vshrl.u32 %v960_v14, %v317_v63 }
  0xd7   : > { %v332_v18 = vshrl.u32 %v961_v17, %v317_v63  ;;  %v318_v19 = vshrl.u32 %v956_v3, %v317_v63  ;;  %vm336_vm4 = vcmp.lt.s32.totalorder %v315_v61, 3  ;;  %vm337_vm5 = vcmp.lt.s32.totalorder %v315_v61, 4 }
  0xd8   : > { %v321_v20 = vor.u32 %v320_v9, %v319_v4  ;;  %v324_v21 = vor.u32 %v323_v10, %v322_v6  ;;  %v327_v22 = vor.u32 %v326_v12, %v325_v8  ;;  %v330_v23 = vor.u32 %v329_v15, %v328_v13 }
  0xd9   : > { %v333_v24 = vor.u32 %v332_v18, %v331_v16  ;;  %v424_v32 = vshrl.u32 %v957_v5, %v421_v2  ;;  %vm335_vm6 = vcmp.lt.s32.totalorder %v315_v61, 2  ;;  %v423_v35 = vshll.u32 %v956_v3, %v1100_v59 }
  0xda   : > { %v338_v25 = vsel %vm334_vm3, %v318_v19, %v321_v20  ;;  %v339_v26 = vsel %vm337_vm5, %v327_v22, 2102212464  ;;  %v342_v27 = vsel %vm334_vm3, %v321_v20, %v324_v21  ;;  %v346_v28 = vsel %vm334_vm3, %v324_v21, %v327_v22 }
  0xdb   : > { %v340_v29 = vsel %vm336_vm4, %v324_v21, %v339_v26  ;;  %v343_v30 = vsel %vm337_vm5, %v330_v23, 920167782  ;;  %v347_v31 = vsel %vm337_vm5, %v333_v24, 1326507024  ;;  %v426_v39 = vshll.u32 %v957_v5, %v1100_v59 }
  0xdc   : > { %v344_v33 = vsel %vm336_vm4, %v327_v22, %v343_v30  ;;  %v348_v34 = vsel %vm336_vm4, %v330_v23, %v347_v31  ;;  %v341_v36 = vsel %vm335_vm6, %v338_v25, %v340_v29  ;;  %v425_v48 = vor.u32 %v424_v32, %v423_v35 }
  0xdd   : > { %v345_v37 = vsel %vm335_vm6, %v342_v27, %v344_v33  ;;  %v349_v38 = vsel %vm335_vm6, %v346_v28, %v348_v34  ;;  %v427_v49 = vshrl.u32 %v958_v7, %v421_v2  ;;  %v429_v50 = vshll.u32 %v958_v7, %v1100_v59 }
  0xde   : > { %v1112_v40 = vmul.u32.u64.low %v1104_v0, %v349_v38  ;;  %v1113_v43 = vmul.u32.u64.high %v1104_v0, %v349_v38, %v1112_v40  ;;  %v1116_v44 = vmul.u32.u64.low %v1104_v0, %v345_v37  ;;  %v1117_v47 = vmul.u32.u64.high %v1104_v0, %v345_v37, %v1116_v44 }
  0xdf   : > { %v430_v51 = vshrl.u32 %v959_v11, %v421_v2  ;;  %v422_v52 = vshrl.u32 %v956_v3, %v421_v2  ;;  %v432_v53 = vshll.u32 %v959_v11, %v1100_v59  ;;  %v433_v54 = vshrl.u32 %v960_v14, %v421_v2 }
  0xe0   : > { %v436_v55 = vshrl.u32 %v961_v17, %v421_v2  ;;  %v357_v56 = vmul.u32 %v1104_v0, %v341_v36  ;;  %v428_v57 = vor.u32 %v427_v49, %v426_v39  ;;  %v435_v60 = vshll.u32 %v960_v14, %v1100_v59 }
  0xe1   : > { %v431_v58 = vor.u32 %v430_v51, %v429_v50  ;;  %vm359_vm7 = vc.u32 %v1113_v43, %v1116_v44  ;;  %v360_v61 = vadd.s32 1, %v1117_v47  ;;  %v434_v63 = vor.u32 %v433_v54, %v432_v53 }
  0xe2   : > { %vm438_vm8 = vcmp.lt.s32.totalorder %v1102_v62, 1  ;;  %v437_v4 = vor.u32 %v436_v55, %v435_v60  ;;  %vm440_vm9 = vcmp.lt.s32.totalorder %v1102_v62, 3  ;;  %vm441_vm10 = vcmp.lt.s32.totalorder %v1102_v62, 4 }
  0xe3   : > { %v446_v3 = vsel %vm438_vm8, %v425_v48, %v428_v57  ;;  %v361_v2 = vsel %vm359_vm7, %v360_v61, %v1117_v47  ;;  %v443_v0 = vsel %vm441_vm10, %v431_v58, 2102212464  ;;  %v447_v5 = vsel %vm441_vm10, %v434_v63, 920167782 }
  0xe4   : > { %v450_v6 = vsel %vm438_vm8, %v428_v57, %v431_v58  ;;  %v362_v7 = vadd.s32 %v361_v2, %v357_v56  ;;  %vm439_vm11 = vcmp.lt.s32.totalorder %v1102_v62, 2  ;;  %v448_v59 = vsel %vm440_vm9, %v431_v58, %v447_v5 }
  0xe5   : > { %v451_v8 = vsel %vm441_vm10, %v437_v4, 1326507024  ;;  %v442_v9 = vsel %vm438_vm8, %v422_v52, %v425_v48  ;;  %v444_v10 = vsel %vm440_vm9, %v428_v57, %v443_v0  ;;  %v449_v11 = vsel %vm439_vm11, %v446_v3, %v448_v59 }
  0xe6   : > { %v452_v12 = vsel %vm440_vm9, %v434_v63, %v451_v8  ;;  %v363_v13 = vadd.s32 536870912, %v362_v7  ;;  %v1131_v15 = vmul.u32.u64.low %v1106_v1, %v449_v11  ;;  %v1132_v16 = vmul.u32.u64.high %v1106_v1, %v449_v11, %v1131_v15 }
  0xe7   : > { %v453_v14 = vsel %vm439_vm11, %v450_v6, %v452_v12  ;;  %v445_v20 = vsel %vm439_vm11, %v442_v9, %v444_v10  ;;  %v358_v36 = vadd.s32 %v1116_v44, %v1113_v43  ;;  %vm394_vm6 = vweird.f32 %v1090_v42 }
  0xe8   : > { %v1135_v17 = vmul.u32.u64.low %v1106_v1, %v453_v14  ;;  %v1136_v18 = vmul.u32.u64.high %v1106_v1, %v453_v14, %v1135_v17  ;;  %v364_v19 = vshrl.u32 %v363_v13, 30  ;;  %v464_v62 = vadd.s32 1, %v1132_v16 }
  0xe9   : > { %v461_v22 = vmul.u32 %v1106_v1, %v445_v20  ;;  %vm529_vm7 = vcmask 424960   ;;  %vm498_vm11 = vweird.f32 %v1088_v41 }
  0xea   : > { %v365_v21 = vshll.u32 %v364_v19, 30  ;;  %vm463_vm12 = vc.u32 %v1136_v18, %v1131_v15  ;;  %v462_v56 = vadd.s32 %v1131_v15, %v1136_v18  ;;  %v388_v44 = vsub.s32 4, %v364_v19 }
  0xeb   : > { %v465_v24 = vsel %vm463_vm12, %v464_v62, %v1132_v16 }
  0xec   : > { %v366_v23 = vsub.s32 %v362_v7, %v365_v21  ;;  %v466_v25 = vadd.s32 %v465_v24, %v461_v22  ;;  %v389_v5 = vsel %vm304_vm15, %v388_v44, %v364_v19  ;;  %v723_v24 = vld [vmem:[%s1214_s3] ss:$0 sm:$0xff] }
  0xed   : > { %v391_v59 = vsel %vm303_vm0, 0, %v389_v5 }
  0xee   : > { %v368_v26 = vsub.s32 0, %v366_v23  ;;  %v467_v27 = vadd.s32 536870912, %v466_v25  ;;  %v395_v12 = vadd.s32 3, %v391_v59 }
  0xf0   : > { %v716_v28 = vmin.u32 %v368_v26, %v366_v23  ;;  %v468_v29 = vshrl.u32 %v467_v27, 30  ;;  %v396_v15 = vand.u32 3, %v395_v12 }
  0xf2   : > { %v370_v30 = vclz %v716_v28  ;;  %v469_v31 = vshll.u32 %v468_v29, 30  ;;  %v492_v11 = vsub.s32 4, %v468_v29  ;;  %vm401_vm3 = vcmp.eq.s32.totalorder %v396_v15, 2 }
  0xf3   : > { %vm398_vm4 = vcmp.eq.s32.totalorder %v396_v15, 0  ;;  %vm397_vm5 = vcmp.lt.s32.totalorder %v396_v15, 2 }
  0xf4   : > { %v717_v32 = vadd.s32 4294967294, %v370_v30  ;;  %v470_v33 = vsub.s32 %v466_v25, %v469_v31  ;;  %v493_v14 = vsel %vm408_vm1, %v492_v11, %v468_v29 }
  0xf5   : > { %v495_v18 = vsel %vm407_vm2, 0, %v493_v14 }
  0xf6   : > { %vm718_vm13 = vcmp.lt.s32.totalorder %v717_v32, 0  ;;  %v472_v35 = vsub.s32 0, %v470_v33  ;;  %v499_v22 = vadd.s32 3, %v495_v18 }
  0xf7   : > { %v373_v34 = vsel %vm718_vm13, 0, %v717_v32 }
  0xf8   : > { %v374_v1 = vsub.s32 32, %v373_v34  ;;  %v378_v37 = vsub.s32 4294967266, %v373_v34  ;;  %v720_v38 = vmin.u32 %v472_v35, %v470_v33  ;;  %v375_v39 = vshll.u32 %v366_v23, %v373_v34 }
  0xf9   : > { %v500_v26 = vand.u32 3, %v499_v22 }
  0xfa   : > { %v376_v40 = vshrl.u32 %v358_v36, %v374_v1  ;;  %v379_v47 = vadd.s32 127, %v378_v37  ;;  %v474_v48 = vclz %v720_v38 }
  0xfb   : > { %vm505_vm8 = vcmp.eq.s32.totalorder %v500_v26, 2  ;;  %vm502_vm9 = vcmp.eq.s32.totalorder %v500_v26, 0  ;;  %vm501_vm10 = vcmp.lt.s32.totalorder %v500_v26, 2 }
  0xfc   : > { %v377_v49 = vor.u32 %v376_v40, %v375_v39  ;;  %v380_v50 = vshll.u32 %v379_v47, 23  ;;  %v721_v51 = vadd.s32 4294967294, %v474_v48 }
  0xfe   : > { %v381_v52 = vor.u32 4788187, %v380_v50  ;;  %vm722_vm14 = vcmp.lt.s32.totalorder %v721_v51, 0  ;;  %v384_v54 = vcvt.s32.f32 %v377_v49 }
  0xff   : > { %v477_v55 = vsel %vm722_vm14, 0, %v721_v51 }
 0x100   : > { %v382_v53 = vand.u32 2147483647, %v381_v52  ;;  %v478_v57 = vsub.s32 32, %v477_v55  ;;  %v482_v58 = vsub.s32 4294967266, %v477_v55  ;;  %v479_v60 = vshll.u32 %v470_v33, %v477_v55 }
 0x102   : > { %v385_v43 = vmul.f32 %v384_v54, %v382_v53  ;;  %v480_v61 = vshrl.u32 %v462_v56, %v478_v57  ;;  %v483_v63 = vadd.s32 127, %v482_v58 }
 0x104   : > { %v386_v4 = vxor.u32 2147483648, %v385_v43  ;;  %v481_v3 = vor.u32 %v480_v61, %v479_v60  ;;  %v484_v2 = vshll.u32 %v483_v63, 23 }
 0x106   : > { %v387_v0 = vsel %vm304_vm15, %v386_v4, %v385_v43  ;;  %v485_v7 = vor.u32 4788187, %v484_v2  ;;  %v488_v9 = vcvt.s32.f32 %v481_v3 }
 0x107   : > { %v390_v6 = vsel %vm303_vm0, %v1090_v42, %v387_v0 }
 0x108   : > { %846 = vcosq.f32 %v390_v6  ;;  %v486_v8 = vand.u32 2147483647, %v485_v7 }
 0x109   : > { %848 = vsinq.f32 %v390_v6 }
 0x10a   : > { %v489_v10 = vmul.f32 %v488_v9, %v486_v8 }
 0x10c   : > { %v490_v13 = vxor.u32 2147483648, %v489_v10 }
 0x10e   : > { %v491_v45 = vsel %vm408_vm1, %v490_v13, %v489_v10 }
 0x10f   : > { %v494_v16 = vsel %vm407_vm2, %v1088_v41, %v491_v45 }
 0x110   : > { %850 = vcosq.f32 %v494_v16 }
 0x111   : > { %852 = vsinq.f32 %v494_v16 }
 0x112   : > { %v847_v17 = vpop.eup %846 }
 0x113   : > { %v849_v19 = vpop.eup %848  ;;  %v402_v20 = vxor.u32 2147483648, %v847_v17 }
 0x114   : > { %v399_v21 = vxor.u32 2147483648, %v849_v19 }
 0x115   : > { %v403_v62 = vsel %vm401_vm3, %v402_v20, %v849_v19 }
 0x116   : > { %v400_v23 = vsel %vm398_vm4, %v847_v17, %v399_v21 }
 0x117   : > { %v404_v46 = vsel %vm397_vm5, %v400_v23, %v403_v62 }
 0x118   : > { %v405_v25 = vsel %vm394_vm6, nan, %v404_v46 }
 0x119   : > { %v510_v27 = vsub.f32 %v405_v25, %v1090_v42 }
 0x11a   : > { %v851_v28 = vpop.eup %850 }
 0x11b   : > { %v518_v29 = vmul.f32 %v723_v24, %v510_v27  ;;  %v853_v30 = vpop.eup %852  ;;  %v506_v31 = vxor.u32 2147483648, %v851_v28 }
 0x11c   : > { %v503_v32 = vxor.u32 2147483648, %v853_v30 }
 0x11d   : > { %v520_v33 = vadd.f32 %v518_v29, %v1090_v42  ;;  %v507_v34 = vsel %vm505_vm8, %v506_v31, %v853_v30 }
 0x11e   : > { %v504_v35 = vsel %vm502_vm9, %v851_v28, %v503_v32 }
 0x11f   : > { %756 = vmatprep.mubr.msk.f32.mxu0 %vm529_vm7, %v520_v33  ;;  %v508_v36 = vsel %vm501_vm10, %v504_v35, %v507_v34 }
 0x120   : > { %v509_v1 = vsel %vm498_vm11, nan, %v508_v36 }
 0x121   : > { %v511_v37 = vsub.f32 %v509_v1, %v1088_v41 }
 0x123   : > { %v519_v38 = vmul.f32 %v723_v24, %v511_v37 }
 0x125   : > { %v521_v39 = vadd.f32 %v519_v38, %v1088_v41 }
 0x127   : > { %757 = vmatmul.mubr.msk.f32.vlgmr.msra.gmra.mrb[0].mxu0 %vm529_vm7, %v521_v39 }
 0x1fa   : > { %v758_v42 = vpop.f32.mrb[0].mxu0 }
 0x1fb   : > { %616 = vst [vmem:[%s233_s23 + $0x8] sm:$0xff] %v758_v42  ;;  %v606_v41 = vpop.f32.mrb[1].mxu0 }
 0x1fc   : > { %615 = vst [vmem:[%s233_s23] sm:$0xff] %v606_v41 }
 0x1fd   : > { %895 = shalt.err (!%p892_p7)
}
 0x1fe   : > { %s896_s12 = scalar_lea.hbm %s1168_s9, 256  ;;  %s900_s15 = scalar_lea.hbm %s1216_s5, 512 }
 0x1ff   : > { %p897_p8 = scmp.ne.s32.totalorder %s1168_s9, %s896_s12  ;;  %p901_p1 = scmp.lt.u32.totalorder %s1168_s9, %s1216_s5 }
 0x200   : > { %p902_p0 = scmp.lt.u32.totalorder %s900_s15, %s896_s12  ;;  %p904_p6 = scmp.lt.u32.totalorder %s896_s12, %s1168_s9 }
 0x201   : > { %p898_p11 = pnand %p897_p8, %p1227_p9 }
 0x202   : > { %p903_p5 = por %p902_p0, %p901_p1 }
 0x203   : > { %p899_p13 = pneg %p898_p11 }
 0x204   : > { %p905_p10 = por %p904_p6, %p903_p5 }
 0x206   : > { %p906_p12 = pnand %p905_p10, %p899_p13 }
 0x208   : > { %909 = shalt.err (!%p906_p12)
}
 0x209   : > { %s963_s23 = smov 128   ;;  %s964_s26 = smov 8  }
 0x20a   : > { %783 = dma.vmem_to_hbm [thread:$0]  (%p1227_p9), %s1163_s25, 256, %s1168_s9, %s1170_s7, %s963_s23, %s963_s23, %s964_s26  }
 0x20b PF: > { %p795_p2 = scmp.ge.s32.totalorder %s948_s21, 2  ;;  %s646_s6 = sand.u32 1, %s936_s18  }
 0x20c   : > { %p1228_p3 = scmp.ne.s32.totalorder %s1221_s29, 0  ;;  %s647_s8 = scalar_lea.sflag [#allocation4], %s646_s6 }
 0x20e   : > { %p790_p4 = pnand %p795_p2, %p1228_p3 }
 0x210   : > { %931 = dma.done.wait (!%p790_p4), %s647_s8, 256  }
 0x211   : > { %933 = vsyncadd (!%p790_p4), %s647_s8, 4294967040  ;;  %p16_p7 = scmp.ge.s32.totalorder %s1020_s24, 4   ;;  %s1229_s18 = smov %s940_s19 }
 0x212   : > { %s1230_s19 = smov %s944_s20  ;;  %s1231_s20 = smov %s1031_s27 }
 0x213   : > { %s1232_s21 = smov %s1020_s24  ;;  %18 = sbr.rel (!%p16_p7) target bundleno = 4 (0x4), region = 80 }
 0x21a   :  { %652 = vsyncpa [#allocation3], 1 }
 0x21b   :  { %654 = vsyncpa [#allocation3 + $0x1], 1 }
 0x21c   :  { %655 = vsyncpa [#allocation4], 1 }
 0x21d   :  { %657 = vsyncpa [#allocation4 + $0x1], 1 }

</bundles_post_ra>
